<compile_context>
chip_gen: v6e
topology: v6e:2x2x1
jax: 0.10.0
libtpu: 0.0.40
codegen_flags: <defaults>
</compile_context>

<pallas_src>
import functools
import math

import jax
import jax.numpy as jnp
from jax.experimental import pallas as pl
from jax.experimental.pallas import tpu as pltpu


# ----------------------------- fused kernel ----------------------------------

def gcn_fused_kernel(adj_ref, x_ref, w_ref, b_ref, out_ref,
                     h_ref, sup_ref, acc_ref, *, nclass):
    """Grid = (layer L, row-tile I, k-tile K).

    adj_ref : (tm, tk)            streamed adjacency tile
    x_ref   : (N_pad, F_pad)      input features (resident; read once at l==0)
    w_ref   : (1, F_pad, F_pad)   weight of current layer
    b_ref   : (1, 1, F_pad)       bias of current layer
    out_ref : (tm, F_pad)         final softmax output row tile
    h_ref   : (N_pad, F_pad) VMEM scratch  -- node features, carried across layers
    sup_ref : (N_pad, F_pad) VMEM scratch  -- support = h @ W  of current layer
    acc_ref : (tm, F_pad)   VMEM scratch  -- f32 accumulator for A @ support
    """
    l = pl.program_id(0)
    i = pl.program_id(1)
    k = pl.program_id(2)
    n_layers = pl.num_programs(0)
    kt = pl.num_programs(2)
    tm, tk = adj_ref.shape

    # Layer 0 initialization: load the input features into the resident h buffer.
    @pl.when((l == 0) & (i == 0) & (k == 0))
    def _():
        h_ref[...] = x_ref[...]

    # Once per layer: support = H @ W_l  (stays resident in VMEM for all row tiles).
    @pl.when((i == 0) & (k == 0))
    def _():
        sup_ref[...] = jnp.dot(h_ref[...], w_ref[0],
                               preferred_element_type=jnp.float32)

    # Reduction over adjacency column tiles: acc += A[i, k] @ support[k].
    @pl.when(k == 0)
    def _():
        acc_ref[...] = jnp.zeros_like(acc_ref)

    koff = pl.multiple_of(k * tk, tk)
    acc_ref[...] += jnp.dot(adj_ref[...], sup_ref[pl.ds(koff, tk), :],
                            preferred_element_type=jnp.float32)

    # Finalize this row tile: bias added exactly once, write back into h.
    @pl.when(k == kt - 1)
    def _():
        h_rows = acc_ref[...] + b_ref[0]
        roff = pl.multiple_of(i * tm, tm)
        h_ref[pl.ds(roff, tm), :] = h_rows

        # Last layer: masked, numerically-stable softmax over the real classes.
        @pl.when(l == n_layers - 1)
        def _():
            col = jax.lax.broadcasted_iota(jnp.int32, h_rows.shape, 1)
            valid = col < nclass
            z = jnp.where(valid, h_rows, -jnp.inf)
            m = jnp.max(z, axis=1, keepdims=True)
            e = jnp.where(valid, jnp.exp(z - m), 0.0)
            denom = jnp.sum(e, axis=1, keepdims=True)
            out_ref[...] = e * pl.reciprocal(denom, approx=True)


# ----------------------------- wrapper ----------------------------------------

def _round_up(a, m):
    return (a + m - 1) // m * m


def gcn_forward(adj, x, params, nclass):
    """params: list of (weight [F_in, F_out], bias [1, F_out]) per GraphConv layer.

    Computes softmax(A @ (... A @ (A @ (X W0) + b0) W1 + b1 ...), axis=1).
    Dropout between layers is identity in eval/inference mode.
    # TODO(synk): nn.Dropout is stochastic in training; reproduced here in eval
    # mode (identity), which is the deterministic forward.
    """
    N = adj.shape[0]
    nfeat = x.shape[1]
    L = len(params)

    # Lane-dense feature padding (multiple of 128).
    feat_dims = [nfeat] + [w.shape[1] for (w, _) in params]
    F_pad = max(128, _round_up(max(feat_dims), 128))

    # Tile sizes for the A @ support reduction (sized for v7x's 64 MiB VMEM too).
    if N <= 128:
        N_pad = _round_up(N, 8)
        tm = tk = N_pad                      # single tile, still (8,128)-legal
    elif N < 512:
        tm = tk = 128
        N_pad = _round_up(N, 128)
    else:
        tm, tk = 128, 512                    # ~0.25 MiB adj tile f32, double-buffered
        N_pad = _round_up(N, tk)

    # Zero-padding keeps the math exact on the real rows/columns.
    adj_p = jnp.zeros((N_pad, N_pad), jnp.float32).at[:N, :N].set(
        adj.astype(jnp.float32))
    x_p = jnp.zeros((N_pad, F_pad), jnp.float32).at[:N, :nfeat].set(
        x.astype(jnp.float32))

    w_all = jnp.zeros((L, F_pad, F_pad), jnp.float32)
    b_all = jnp.zeros((L, 1, F_pad), jnp.float32)
    for li, (w, b) in enumerate(params):
        fin, fout = w.shape
        w_all = w_all.at[li, :fin, :fout].set(w.astype(jnp.float32))
        b_all = b_all.at[li, :1, :fout].set(b.reshape(1, fout).astype(jnp.float32))

    # Explicit scoped-VMEM budget (scratch + double-buffered streamed blocks).
    est = 4 * (3 * N_pad * F_pad            # h, support scratch + resident x
               + tm * F_pad                 # accumulator
               + 2 * tm * tk                # adj blocks (double-buffered)
               + 2 * F_pad * F_pad          # weight blocks
               + 2 * F_pad                  # bias blocks
               + 2 * tm * F_pad)            # output blocks
    vmem_limit = int(min(max(2 * est, 16 * 2 ** 20), 48 * 2 ** 20))

    kernel = functools.partial(gcn_fused_kernel, nclass=nclass)

    out_p = pl.pallas_call(
        kernel,
        out_shape=jax.ShapeDtypeStruct((N_pad, F_pad), jnp.float32),
        grid_spec=pltpu.PrefetchScalarGridSpec(
            num_scalar_prefetch=0,
            grid=(L, N_pad // tm, N_pad // tk),
            in_specs=[
                pl.BlockSpec((tm, tk), lambda l, i, k: (i, k)),          # adj tile
                pl.BlockSpec((N_pad, F_pad), lambda l, i, k: (0, 0)),    # x (resident)
                pl.BlockSpec((1, F_pad, F_pad), lambda l, i, k: (l, 0, 0)),  # W_l
                pl.BlockSpec((1, 1, F_pad), lambda l, i, k: (l, 0, 0)),  # b_l
            ],
            out_specs=pl.BlockSpec((tm, F_pad), lambda l, i, k: (i, 0)),
            scratch_shapes=[
                pltpu.VMEM((N_pad, F_pad), jnp.float32),   # h (carried across layers)
                pltpu.VMEM((N_pad, F_pad), jnp.float32),   # support of current layer
                pltpu.VMEM((tm, F_pad), jnp.float32),      # row-tile accumulator
            ],
        ),
        compiler_params=pltpu.CompilerParams(
            # Row axis must stay sequential: layer l+1 reads ALL row tiles of
            # layer l via the VMEM h scratch (cannot megacore-split it).
            dimension_semantics=("arbitrary", "arbitrary", "arbitrary"),
            vmem_limit_bytes=vmem_limit,
        ),
    )(adj_p, x_p, w_all, b_all)

    return out_p[:N, :nclass]


# ----------------------------- parameter init ---------------------------------

def init_gcn_params(key, nfeat, nlayers, nhid, nclass):
    dims = [(nfeat, nhid)] + [(nhid, nhid)] * (nlayers - 1) + [(nhid, nclass)]
    params = []
    for (fin, fout) in dims:
        stdv = 1.0 / math.sqrt(fout)
        key, kw, kb = jax.random.split(key, 3)
        w = jax.random.uniform(kw, (fin, fout), jnp.float32, -stdv, stdv)
        b = jax.random.uniform(kb, (1, fout), jnp.float32, -stdv, stdv)
        params.append((w, b))
    return params


# ----------------------------- main --------------------------------------------

if __name__ == "__main__":
    key = jax.random.PRNGKey(0)
    N, nfeat, nlayers, nhid, nclass = 16, 8, 2, 32, 4

    key, k_adj, k_x, k_p = jax.random.split(key, 4)
    # deterministic "graph": random binary adjacency with self loops, dense f32
    adj = (jax.random.uniform(k_adj, (N, N)) < 0.3).astype(jnp.float32)
    adj = jnp.maximum(adj, jnp.eye(N, dtype=jnp.float32))
    x = jax.random.normal(k_x, (N, nfeat), jnp.float32)

    params = init_gcn_params(k_p, nfeat, nlayers, nhid, nclass)

    out = gcn_forward(adj, x, params, nclass=nclass)
    out = jax.block_until_ready(out)

    # pure-JAX reference check
    h_ref = x
    for w, b in params:
        h_ref = adj @ (h_ref @ w) + b
    ref = jax.nn.softmax(h_ref, axis=1)
    assert out.shape == (N, nclass)
    # approx reciprocal in the softmax normalization -> slightly relaxed tolerance
    assert jnp.allclose(out, ref, atol=3e-3, rtol=3e-3), "mismatch vs reference"

    print("KERNEL_OK")
</pallas_src>

<mosaic_0001>
module attributes {stable_mosaic.version = 11 : i64} {
  func.func @gcn_fused_kernel(%arg0: i32, %arg1: i32, %arg2: i32, %arg3: memref<16x16xf32, #tpu.memory_space<vmem>>, %arg4: memref<16x128xf32, #tpu.memory_space<vmem>>, %arg5: memref<1x128x128xf32, #tpu.memory_space<vmem>>, %arg6: memref<1x1x128xf32, #tpu.memory_space<vmem>>, %arg7: memref<16x128xf32, #tpu.memory_space<vmem>>, %arg8: memref<16x128xf32, #tpu.memory_space<vmem>>, %arg9: memref<16x128xf32, #tpu.memory_space<vmem>>, %arg10: memref<16x128xf32, #tpu.memory_space<vmem>>) attributes {dimension_semantics = [#tpu.dimension_semantics<arbitrary>, #tpu.dimension_semantics<arbitrary>, #tpu.dimension_semantics<arbitrary>], iteration_bounds = array<i64: 3, 1, 1>, scalar_prefetch = 0 : i64, scratch_operands = 3 : i64, tpu.core_type = #tpu.core_type<tc>, window_params = [{transform_indices = @transform_0, window_bounds = array<i64: 16, 16>}, {pipeline_mode = #tpu.pipeline_mode<synchronous>, transform_indices = @transform_1, window_bounds = array<i64: 16, 128>}, {transform_indices = @transform_2, window_bounds = array<i64: 1, 128, 128>}, {transform_indices = @transform_3, window_bounds = array<i64: 1, 1, 128>}, {transform_indices = @transform_4, window_bounds = array<i64: 16, 128>}]} {
    %c0_i32 = arith.constant 0 : i32
    %0 = arith.cmpi eq, %arg0, %c0_i32 : i32
    %c0_i32_0 = arith.constant 0 : i32
    %1 = arith.cmpi eq, %arg1, %c0_i32_0 : i32
    %2 = arith.andi %0, %1 : i1
    %c0_i32_1 = arith.constant 0 : i32
    %3 = arith.cmpi eq, %arg2, %c0_i32_1 : i32
    %4 = arith.andi %2, %3 : i1
    %5 = arith.extui %4 : i1 to i32
    %c0_i32_2 = arith.constant 0 : i32
    %6 = arith.cmpi ne, %5, %c0_i32_2 : i32
    scf.if %6 {
      %c0_16 = arith.constant 0 : index
      %c0_17 = arith.constant 0 : index
      %27 = vector.load %arg4[%c0_16, %c0_17] : memref<16x128xf32, #tpu.memory_space<vmem>>, vector<16x128xf32>
      %c0_18 = arith.constant 0 : index
      %c0_19 = arith.constant 0 : index
      %28 = vector.load %arg8[%c0_18, %c0_19] : memref<16x128xf32, #tpu.memory_space<vmem>>, vector<16x128xf32>
      tpu.vector_store %arg8[%c0_18, %c0_19], %27 {strides = array<i32>} : memref<16x128xf32, #tpu.memory_space<vmem>>, vector<16x128xf32>,
    } else {
    }
    %c0_i32_3 = arith.constant 0 : i32
    %7 = arith.cmpi eq, %arg1, %c0_i32_3 : i32
    %c0_i32_4 = arith.constant 0 : i32
    %8 = arith.cmpi eq, %arg2, %c0_i32_4 : i32
    %9 = arith.andi %7, %8 : i1
    %10 = arith.extui %9 : i1 to i32
    %c0_i32_5 = arith.constant 0 : i32
    %11 = arith.cmpi ne, %10, %c0_i32_5 : i32
    scf.if %11 {
      %c0_16 = arith.constant 0 : index
      %c0_17 = arith.constant 0 : index
      %27 = vector.load %arg8[%c0_16, %c0_17] : memref<16x128xf32, #tpu.memory_space<vmem>>, vector<16x128xf32>
      %c0_18 = arith.constant 0 : index
      %c0_19 = arith.constant 0 : index
      %c0_20 = arith.constant 0 : index
      %28 = vector.load %arg5[%c0_18, %c0_19, %c0_20] : memref<1x128x128xf32, #tpu.memory_space<vmem>>, vector<1x128x128xf32>
      %29 = vector.shape_cast %28 : vector<1x128x128xf32> to vector<128x128xf32>
      %cst_21 = arith.constant dense<0.000000e+00> : vector<16x128xf32>
      %30 = tpu.matmul %27, %29, %cst_21 {dimension_numbers = #tpu.dot_dimension_numbers<[1], [0], [0], [1], [0, 0, 1, 1], [], []>} : vector<16x128xf32>, vector<128x128xf32>, vector<16x128xf32> -> vector<16x128xf32>
      %c0_22 = arith.constant 0 : index
      %c0_23 = arith.constant 0 : index
      %31 = vector.load %arg9[%c0_22, %c0_23] : memref<16x128xf32, #tpu.memory_space<vmem>>, vector<16x128xf32>
      tpu.vector_store %arg9[%c0_22, %c0_23], %30 {strides = array<i32>} : memref<16x128xf32, #tpu.memory_space<vmem>>, vector<16x128xf32>,
    } else {
    }
    %c0_i32_6 = arith.constant 0 : i32
    %12 = arith.cmpi eq, %arg2, %c0_i32_6 : i32
    %13 = arith.extui %12 : i1 to i32
    %c0_i32_7 = arith.constant 0 : i32
    %14 = arith.cmpi ne, %13, %c0_i32_7 : i32
    scf.if %14 {
      %cst_16 = arith.constant 0.000000e+00 : f32
      %27 = vector.broadcast %cst_16 : f32 to vector<16x128xf32>
      %c0_17 = arith.constant 0 : index
      %c0_18 = arith.constant 0 : index
      %28 = vector.load %arg10[%c0_17, %c0_18] : memref<16x128xf32, #tpu.memory_space<vmem>>, vector<16x128xf32>
      tpu.vector_store %arg10[%c0_17, %c0_18], %27 {strides = array<i32>} : memref<16x128xf32, #tpu.memory_space<vmem>>, vector<16x128xf32>,
    } else {
    }
    %c16_i32 = arith.constant 16 : i32
    %15 = arith.muli %arg2, %c16_i32 : i32
    %16 = tpu.assume_multiple %15, 16 : i32
    %c0 = arith.constant 0 : index
    %c0_8 = arith.constant 0 : index
    %17 = vector.load %arg10[%c0, %c0_8] : memref<16x128xf32, #tpu.memory_space<vmem>>, vector<16x128xf32>
    %c0_9 = arith.constant 0 : index
    %c0_10 = arith.constant 0 : index
    %18 = vector.load %arg3[%c0_9, %c0_10] : memref<16x16xf32, #tpu.memory_space<vmem>>, vector<16x16xf32>
    %19 = arith.index_cast %16 : i32 to index
    %c0_11 = arith.constant 0 : index
    %20 = vector.load %arg9[%19, %c0_11] : memref<16x128xf32, #tpu.memory_space<vmem>>, vector<16x128xf32>
    %cst = arith.constant dense<0.000000e+00> : vector<16x128xf32>
    %21 = tpu.matmul %18, %20, %cst {dimension_numbers = #tpu.dot_dimension_numbers<[1], [0], [0], [1], [0, 0, 1, 1], [], []>} : vector<16x16xf32>, vector<16x128xf32>, vector<16x128xf32> -> vector<16x128xf32>
    %22 = arith.addf %17, %21 : vector<16x128xf32>
    %c0_12 = arith.constant 0 : index
    %c0_13 = arith.constant 0 : index
    %23 = vector.load %arg10[%c0_12, %c0_13] : memref<16x128xf32, #tpu.memory_space<vmem>>, vector<16x128xf32>
    tpu.vector_store %arg10[%c0_12, %c0_13], %22 {strides = array<i32>} : memref<16x128xf32, #tpu.memory_space<vmem>>, vector<16x128xf32>,
    %c0_i32_14 = arith.constant 0 : i32
    %24 = arith.cmpi eq, %arg2, %c0_i32_14 : i32
    %25 = arith.extui %24 : i1 to i32
    %c0_i32_15 = arith.constant 0 : i32
    %26 = arith.cmpi ne, %25, %c0_i32_15 : i32
    scf.if %26 {
      %c0_16 = arith.constant 0 : index
      %c0_17 = arith.constant 0 : index
      %27 = vector.load %arg10[%c0_16, %c0_17] : memref<16x128xf32, #tpu.memory_space<vmem>>, vector<16x128xf32>
      %c0_18 = arith.constant 0 : index
      %c0_19 = arith.constant 0 : index
      %c0_20 = arith.constant 0 : index
      %28 = vector.load %arg6[%c0_18, %c0_19, %c0_20] : memref<1x1x128xf32, #tpu.memory_space<vmem>>, vector<1x1x128xf32>
      %29 = vector.shape_cast %28 : vector<1x1x128xf32> to vector<1x128xf32>
      %30 = vector.broadcast %29 : vector<1x128xf32> to vector<16x128xf32>
      %31 = arith.addf %27, %30 : vector<16x128xf32>
      %c16_i32_21 = arith.constant 16 : i32
      %32 = arith.muli %arg1, %c16_i32_21 : i32
      %33 = tpu.assume_multiple %32, 16 : i32
      %34 = arith.index_cast %33 : i32 to index
      %c0_22 = arith.constant 0 : index
      %35 = vector.load %arg8[%34, %c0_22] : memref<16x128xf32, #tpu.memory_space<vmem>>, vector<16x128xf32>
      tpu.vector_store %arg8[%34, %c0_22], %31 {strides = array<i32>} : memref<16x128xf32, #tpu.memory_space<vmem>>, vector<16x128xf32>,
      %c2_i32 = arith.constant 2 : i32
      %36 = arith.cmpi eq, %arg0, %c2_i32 : i32
      %37 = arith.extui %36 : i1 to i32
      %c0_i32_23 = arith.constant 0 : i32
      %38 = arith.cmpi ne, %37, %c0_i32_23 : i32
      scf.if %38 {
        %39 = tpu.iota {dimensions = array<i32: 1>} : vector<16x128xi32>
        %c4_i32 = arith.constant 4 : i32
        %40 = vector.broadcast %c4_i32 : i32 to vector<16x128xi32>
        %41 = arith.cmpi slt, %39, %40 : vector<16x128xi32>
        %cst_24 = arith.constant 0xFF800000 : f32
        %42 = vector.broadcast %cst_24 : f32 to vector<16x128xf32>
        %43 = arith.select %41, %31, %42 : vector<16x128xi1>, vector<16x128xf32>
        %cst_25 = arith.constant dense<0xFF800000> : vector<16xf32>
        %44 = vector.multi_reduction <maximumf>, %43, %cst_25 [1] : vector<16x128xf32> to vector<16xf32>
        %45 = vector.shape_cast %44 : vector<16xf32> to vector<16x1xf32>
        %46 = vector.broadcast %45 : vector<16x1xf32> to vector<16x128xf32>
        %47 = arith.subf %43, %46 : vector<16x128xf32>
        %48 = math.exp %47 : vector<16x128xf32>
        %cst_26 = arith.constant 0.000000e+00 : f32
        %49 = vector.broadcast %cst_26 : f32 to vector<16x128xf32>
        %50 = arith.select %41, %48, %49 : vector<16x128xi1>, vector<16x128xf32>
        %cst_27 = arith.constant dense<0.000000e+00> : vector<16xf32>
        %51 = vector.multi_reduction <add>, %50, %cst_27 [1] : vector<16x128xf32> to vector<16xf32>
        %52 = vector.shape_cast %51 : vector<16xf32> to vector<16x1xf32>
        %53 = tpu.reciprocal %52 {approx = true} : vector<16x1xf32> -> vector<16x1xf32>
        %54 = vector.broadcast %53 : vector<16x1xf32> to vector<16x128xf32>
        %55 = arith.mulf %50, %54 : vector<16x128xf32>
        %c0_28 = arith.constant 0 : index
        %c0_29 = arith.constant 0 : index
        %56 = vector.load %arg7[%c0_28, %c0_29] : memref<16x128xf32, #tpu.memory_space<vmem>>, vector<16x128xf32>
        tpu.vector_store %arg7[%c0_28, %c0_29], %55 {strides = array<i32>} : memref<16x128xf32, #tpu.memory_space<vmem>>, vector<16x128xf32>,
      } else {
      }
    } else {
    }
    return
  }
  func.func @transform_0(%arg0: i32, %arg1: i32, %arg2: i32) -> (i32, i32) {
    %c0_i32 = arith.constant 0 : i32
    return %arg1, %arg2 : i32, i32
  }
  func.func @transform_1(%arg0: i32, %arg1: i32, %arg2: i32) -> (i32, i32) {
    %c0_i32 = arith.constant 0 : i32
    %c0_i32_0 = arith.constant 0 : i32
    %c0_i32_1 = arith.constant 0 : i32
    return %c0_i32, %c0_i32_0 : i32, i32
  }
  func.func @transform_2(%arg0: i32, %arg1: i32, %arg2: i32) -> (i32, i32, i32) {
    %c0_i32 = arith.constant 0 : i32
    %c0_i32_0 = arith.constant 0 : i32
    %c0_i32_1 = arith.constant 0 : i32
    return %arg0, %c0_i32, %c0_i32_0 : i32, i32, i32
  }
  func.func @transform_3(%arg0: i32, %arg1: i32, %arg2: i32) -> (i32, i32, i32) {
    %c0_i32 = arith.constant 0 : i32
    %c0_i32_0 = arith.constant 0 : i32
    %c0_i32_1 = arith.constant 0 : i32
    return %arg0, %c0_i32, %c0_i32_0 : i32, i32, i32
  }
  func.func @transform_4(%arg0: i32, %arg1: i32, %arg2: i32) -> (i32, i32) {
    %c0_i32 = arith.constant 0 : i32
    %c0_i32_0 = arith.constant 0 : i32
    return %arg1, %c0_i32 : i32, i32
  }
}

</mosaic_0001>

<bundles_post_ra>
// kernel: tpu_custom_call.1
= control target key start
LH: loop header
LB: loop body
LE: loop exit
PB: predicated region body
PF: predicated region fallthrough
CT: control target
= control target key end

     0   :  { %9 = vsyncpa [#allocation6], 0  ;;  %s1229_s0 = inlined_call_operand.hbm [shape: f32[16,16], index: 0, kind: input, shape index: {}]   ;;  %s1230_s1 = inlined_call_operand.hbm [shape: f32[16,128], index: 1, kind: input, shape index: {}]   ;;  %s1231_s2 = inlined_call_operand.hbm [shape: f32[3,128,128], index: 2, kind: input, shape index: {}]   ;;  %s1232_s3 = inlined_call_operand.vmem [shape: f32[3,1,128], index: 3, kind: input, shape index: {}]   ;;  %s1233_s4 = inlined_call_operand.hbm [shape: f32[16,128], index: 4, kind: output, shape index: {}]  }
   0x1   :  { %10 = vsyncpa [#allocation9], 0 }
   0x2   :  { %11 = vsyncpa [#allocation7], 0  ;;  %s1039_s15 = smov 0   ;;  %s1041_s16 = smov 0  }
   0x3   :  { %s1043_s17 = smov 0   ;;  %s1045_s18 = smov 0  }
   0x4   :  { %s1047_s19 = smov 0   ;;  %s1049_s20 = smov 0  }
   0x5 LB: > { %s1068_s21 = sadd.s32 4294967295, %s1004_s20   ;;  %p99_p0 = scmp.ne.s32.totalorder %s992_s17, %s988_s16  ;;  %s1004_s20 = sphi %s1049_s20, %s17_s20   ;;  %s1000_s19 = sphi %s1047_s19, %s1249_s19   ;;  %s996_s18 = sphi %s1045_s18, %s1248_s18   ;;  %s992_s17 = sphi %s1043_s17, %s1247_s17   ;;  %s988_s16 = sphi %s1041_s16, %s1246_s16   ;;  %s984_s15 = sphi %s1039_s15, %s1245_s15  }
   0x6   : > { %p100_p1 = scmp.eq.s32.totalorder %s1004_s20, 0  ;;  %p105_p2 = scmp.ne.s32.totalorder %s988_s16, %s984_s15 }
   0x7   : > { %p1234_p3 = scmp.eq.s32.totalorder %s1068_s21, 0  ;;  %p655_p4 = scmp.ge.s32.totalorder %s1004_s20, 1 }
   0x8   : > { %p101_p5 = por %p100_p1, %p99_p0  ;;  %p168_p6 = scmp.lt.s32.totalorder %s1004_s20, 4 }
   0x9   : > { %p1079_p7 = por %p1234_p3, %p105_p2  ;;  %s1006_s24 = smov [#allocation5]  }
   0xa   : > { %p1083_p8 = pnand %p655_p4, %p168_p6  ;;  %s184_s25 = sshll.u32 %s1006_s24, 4  ;;  %s185_s25 = int_to_ptr.vmem [resolvable:$true] %s184_s25 }
   0xb   : > { %p770_p11 = scmp.lt.s32.totalorder %s1004_s20, 3  ;;  %s849_s28 = scalar_lea.vmem %s185_s25, 256 }
   0xc   : > { %p757_p9 = pneg %p1083_p8  ;;  %p850_p0 = scmp.ne.s32.totalorder %s185_s25, %s849_s28 }
   0xd   : > { %p1096_p12 = pnand %p770_p11, %p101_p5  ;;  %p857_p4 = scmp.lt.s32.totalorder %s185_s25, %s185_s25 }
   0xe   : > { %p1091_p10 = pnand %p757_p9, %p1234_p3  ;;  %p858_p6 = scmp.lt.s32.totalorder %s849_s28, %s849_s28 }
  0x10   : > { %p840_p13 = pneg %p1091_p10  ;;  %p859_p9 = por %p858_p6, %p857_p4 }
  0x12   : > { %p852_p1 = pnand %p850_p0, %p840_p13 }
  0x14   : > { %p853_p2 = pneg %p852_p1 }
  0x16   : > { %p860_p3 = pnand %p859_p9, %p853_p2 }
  0x18   : > { %863 = shalt.err (!%p860_p3)
}
  0x19   : > { %s1235_s29 = smov 128   ;;  %s1008_s30 = smov 8  }
  0x1a   : > { %760 = dma.hbm_to_vmem [thread:$0]  (!%p1091_p10), %s1229_s0, 256, %s185_s25, [#allocation6], %s1235_s29, %s1235_s29, %s1008_s30  }
  0x1b   : > { %s1009_s7 = smov [#allocation8]  }
  0x1c   : > { %s197_s8 = sshll.u32 %s1009_s7, 4  ;;  %s198_s8 = int_to_ptr.vmem [resolvable:$true] %s197_s8 }
  0x1d   : > { %s875_s9 = scalar_lea.vmem %s198_s8, 256  ;;  %p883_p0 = scmp.lt.s32.totalorder %s198_s8, %s198_s8 }
  0x1e   : > { %p876_p5 = scmp.ne.s32.totalorder %s198_s8, %s875_s9  ;;  %p884_p1 = scmp.lt.s32.totalorder %s875_s9, %s875_s9 }
  0x20   : > { %p878_p3 = pnand %p876_p5, %p840_p13  ;;  %p885_p2 = por %p884_p1, %p883_p0 }
  0x22   : > { %p879_p11 = pneg %p878_p3 }
  0x24   : > { %p886_p4 = pnand %p885_p2, %p879_p11 }
  0x26   : > { %889 = shalt.err (!%p886_p4)
}
  0x27   : > { %763 = dma.hbm_to_vmem [thread:$0]  (!%p1091_p10), %s1230_s1, 256, %s198_s8, [#allocation9], %s1235_s29, %s1235_s29, %s1008_s30  }
  0x28   : > { %s36_s12 = sadd.s32 1, %s1000_s19  ;;  %s92_s13 = sadd.s32 1, %s992_s17 }
  0x29   : > { %p38_p13 = scmp.ge.s32.totalorder %s36_s12, 3  ;;  %s211_s14 = sand.u32 1, %s1004_s20  }
  0x2a   : > { %s213_s15 = sand.u32 1, %s992_s17   ;;  %s676_s25 = sshll.u32 %s1000_s19, 11 }
  0x2b   : > { %s1251_s12 = smov (%p38_p13, %s36_s12), 0  ;;  %s659_s24 = sshll.u32 %s213_s15, 7 }
  0x2c   : > { %s89_s26 = ssub.s32 %s1000_s19, %s1251_s12  ;;  %s221_s6 = scalar_lea.hbm %s1231_s2, %s676_s25 }
  0x2d   : > { %p90_p6 = scmp.eq.s32.totalorder %s89_s26, 0  ;;  %s215_s7 = scalar_lea.vmem [#allocation10], %s659_s24 }
  0x2e   : > { %s222_s9 = sshll.u32 %s215_s7, 4  ;;  %s212_s10 = scalar_lea.sflag [#allocation6], %s211_s14  ;;  %s223_s9 = int_to_ptr.vmem [resolvable:$true] %s222_s9 }
  0x2f   : > { %s1137_s8 = scalar_select %p90_p6, %s992_s17, %s92_s13  }
  0x30   : > { %p892_p10 = pneg %p1096_p12  ;;  %s903_s11 = scalar_lea.vmem %s223_s9, 2048 }
  0x31   : > { %p904_p9 = scmp.ne.s32.totalorder %s223_s9, %s903_s11  ;;  %s1010_s15 = smov [#allocation10]  }
  0x32   : > { %s908_s29 = sshll.u32 %s1010_s15, 4  ;;  %s909_s29 = int_to_ptr.vmem [resolvable:$false] %s908_s29 }
  0x33   : > { %p906_p5 = pnand %p904_p9, %p892_p10  ;;  %s910_s26 = scalar_lea.vmem %s909_s29, 4096 }
  0x34   : > { %p911_p11 = scmp.lt.s32.totalorder %s223_s9, %s909_s29  ;;  %p912_p0 = scmp.lt.s32.totalorder %s910_s26, %s903_s11 }
  0x35   : > { %p907_p3 = pneg %p906_p5 }
  0x36   : > { %p913_p1 = por %p912_p0, %p911_p11 }
  0x38   : > { %p914_p2 = pnand %p913_p1, %p907_p3 }
  0x3a   : > { %917 = shalt.err (!%p914_p2)
}
  0x3b   : > { %s1240_s13 = smov 128   ;;  %240 = sbr.rel (%p1083_p8) target bundleno = 846 (0x34e), region = 36 }
  0x3c   : > { %767 = dma.hbm_to_vmem [thread:$0]  (!%p1096_p12), %s221_s6, 2048, %s223_s9, %s212_s10, %s1240_s13, %s1240_s13, %s1008_s30  }
  0x3d   : > { %p1241_p4 = scmp.eq.s32.totalorder (!%p1083_p8), %s1068_s21, 0 }
  0x40   : > { %967 = dma.done.wait (%p1241_p4), [#allocation6], 256   ;;  %p1242_p13 = pmov %p1241_p4 }
  0x41   : > { %p1243_p6 = pmov %p1241_p4 }
  0x42   : > { %969 = vsyncadd (%p1242_p13), [#allocation6], 4294967040 }
  0x43   : > { %971 = dma.done.wait (%p1243_p6), [#allocation9], 256   ;;  %p1244_p10 = pmov %p1241_p4 }
  0x44   : > { %s250_s27 = sand.u32 1, %s1068_s21   ;;  %s252_s29 = sand.u32 1, %s988_s16  }
  0x45   : > { %973 = vsyncadd (%p1244_p10), [#allocation9], 4294967040  ;;  %s665_s30 = sshll.u32 %s252_s29, 7  ;;  %s251_s23 = scalar_lea.sflag [#allocation6], %s250_s27 }
  0x46   : > { %s1158_s14 = scalar_lea.vmem [#allocation10], %s665_s30 }
  0x47   : > { %975 = dma.done.wait (%p1079_p7), %s251_s23, 2048  }
  0x48   : > { %977 = vsyncadd (%p1079_p7), %s251_s23, 4294965248  ;;  %p278_p8 = scmp.lt.s32.totalorder %s996_s18, 2  ;;  %p282_p12 = scmp.eq.s32.totalorder %s996_s18, 0 }
  0x49   : > { %v291_v0 = vld [vmem:[#allocation8] sm:$0xff] (%p282_p12)  ;;  %v292_v1 = vld [vmem:[#allocation8 + $0x8] sm:$0xff] (%p282_p12) }
  0x4a   : > { %s1167_s24 = scalar_select %p278_p8, %s996_s18, 2  ;;  %293 = vst [vmem:[#allocation2] sm:$0xff] (%p282_p12), %v291_v0  ;;  %294 = vst [vmem:[#allocation2 + $0x8] sm:$0xff] (%p282_p12), %v292_v1 }
  0x4b   : > { %290 = sbr.rel (!%p282_p12) target bundleno = 80 (0x50), region = 52 }
  0x4c   : > { %s280_s5 = scalar_lea.vmem %s1232_s3, %s1167_s24 }
  0x50 PF: > { %v316_v2 = vld [vmem:[%s1158_s14 + $0x78] sm:$0xff]  ;;  %v315_v3 = vld [vmem:[%s1158_s14 + $0x70] sm:$0xff]  ;;  %v314_v4 = vld [vmem:[%s1158_s14 + $0x68] sm:$0xff]  ;;  %vm407_vm0 = vcmask 130048   ;;  %p671_p7 = scmp.ne.s32.totalorder %s996_s18, 2 }
  0x51   : > { %701 = vmatprep.subr.mxu0 %v316_v2  ;;  %v313_v5 = vld [vmem:[%s1158_s14 + $0x60] sm:$0xff]  ;;  %v299_v6 = vld [vmem:[#allocation2] sm:$0xff]  ;;  %v312_v7 = vld [vmem:[%s1158_s14 + $0x58] sm:$0xff] }
  0x52   : > { %702 = vmatpush3.msra.mxu0 %v316_v2  ;;  %733 = vmatprep.mubr.f32.mxu0 %v299_v6  ;;  %v311_v8 = vld [vmem:[%s1158_s14 + $0x50] sm:$0xff]  ;;  %v310_v9 = vld [vmem:[%s1158_s14 + $0x48] sm:$0xff]  ;;  %v309_v10 = vld [vmem:[%s1158_s14 + $0x40] sm:$0xff] }
  0x53   : > { %703 = vmatprep.subr.mxu0 %v315_v3  ;;  %v308_v11 = vld [vmem:[%s1158_s14 + $0x38] sm:$0xff]  ;;  %v307_v12 = vld [vmem:[%s1158_s14 + $0x30] sm:$0xff]  ;;  %v306_v13 = vld [vmem:[%s1158_s14 + $0x28] sm:$0xff] }
  0x54   : > { %704 = vmatpush3.msra.mxu0 %v315_v3  ;;  %v305_v14 = vld [vmem:[%s1158_s14 + $0x20] sm:$0xff]  ;;  %v304_v15 = vld [vmem:[%s1158_s14 + $0x18] sm:$0xff]  ;;  %v303_v16 = vld [vmem:[%s1158_s14 + $0x10] sm:$0xff] }
  0x55   : > { %705 = vmatprep.subr.mxu0 %v314_v4  ;;  %v302_v17 = vld [vmem:[%s1158_s14 + $0x8] sm:$0xff]  ;;  %v301_v18 = vld [vmem:[%s1158_s14] sm:$0xff]  ;;  %v300_v19 = vld [vmem:[#allocation2 + $0x8] sm:$0xff] }
  0x56   : > { %706 = vmatpush3.msra.mxu0 %v314_v4  ;;  %v402_v20 = vld [vmem:[#allocation5] sm:$0xff]  ;;  %v403_v23 = vld [vmem:[#allocation5 + $0x8] sm:$0xff]  ;;  %v670_v24 = vld [vmem:[%s280_s5] ss:$0 sm:$0xff] }
  0x57   : > { %707 = vmatprep.subr.mxu0 %v313_v5  ;;  %740 = vmatprep.mubr.msk.f32.mxu1 %vm407_vm0, %v402_v20 }
  0x58   : > { %708 = vmatpush3.msra.mxu0 %v313_v5 }
  0x59   : > { %709 = vmatprep.subr.mxu0 %v312_v7 }
  0x5a   : > { %710 = vmatpush3.msra.mxu0 %v312_v7 }
  0x5b   : > { %711 = vmatprep.subr.mxu0 %v311_v8 }
  0x5c   : > { %712 = vmatpush3.msra.mxu0 %v311_v8 }
  0x5d   : > { %713 = vmatprep.subr.mxu0 %v310_v9 }
  0x5e   : > { %714 = vmatpush3.msra.mxu0 %v310_v9 }
  0x5f   : > { %715 = vmatprep.subr.mxu0 %v309_v10 }
  0x60   : > { %716 = vmatpush3.msra.mxu0 %v309_v10 }
  0x61   : > { %717 = vmatprep.subr.mxu0 %v308_v11 }
  0x62   : > { %718 = vmatpush3.msra.mxu0 %v308_v11 }
  0x63   : > { %719 = vmatprep.subr.mxu0 %v307_v12 }
  0x64   : > { %720 = vmatpush3.msra.mxu0 %v307_v12 }
  0x65   : > { %721 = vmatprep.subr.mxu0 %v306_v13 }
  0x66   : > { %722 = vmatpush3.msra.mxu0 %v306_v13 }
  0x67   : > { %723 = vmatprep.subr.mxu0 %v305_v14 }
  0x68   : > { %724 = vmatpush3.msra.mxu0 %v305_v14 }
  0x69   : > { %725 = vmatprep.subr.mxu0 %v304_v15 }
  0x6a   : > { %726 = vmatpush3.msra.mxu0 %v304_v15 }
  0x6b   : > { %727 = vmatprep.subr.mxu0 %v303_v16 }
  0x6c   : > { %728 = vmatpush3.msra.mxu0 %v303_v16 }
  0x6d   : > { %729 = vmatprep.subr.mxu0 %v302_v17 }
  0x6e   : > { %730 = vmatpush3.msra.mxu0 %v302_v17 }
  0x6f   : > { %731 = vmatprep.subr.mxu0 %v301_v18 }
  0x70   : > { %732 = vmatpush3.msra.mxu0 %v301_v18 }
  0x71   : > { %734 = vmatmul.mubr.f32.vlgmr.msra.gmra.mxu0 %v300_v19 }
 0x131   : > { %v735_v21 = vpop.f32.mrf.mxu0 }
 0x132   : > { %736 = vmatprep.subr.mxu1 %v735_v21 }
 0x133   : > { %v383_v22 = vpop.f32.mrf.mxu0  ;;  %737 = vmatpush3.msra.mxu1 %v735_v21 }
 0x134   : > { %738 = vmatprep.subr.mxu1 %v383_v22 }
 0x135   : > { %739 = vmatpush3.msra.mxu1 %v383_v22 }
 0x136   : > { %741 = vmatmul.mubr.msk.f32.vlgmr.msra.gmra.mxu1 %vm407_vm0, %v403_v23 }
 0x1f6   : > { %v742_v25 = vpop.f32.mrf.mxu1 }
 0x1f7   : > { %v506_v26 = vadd.f32 %v742_v25, %v670_v24  ;;  %514 = sbr.rel (%p671_p7) target bundleno = 830 (0x33e), region = 68 }
 0x1f8   : > { %v480_v27 = vpop.f32.mrf.mxu1 }
 0x1f9   : > { %510 = vst [vmem:[#allocation2 + $0x8] sm:$0xff] %v506_v26  ;;  %v505_v28 = vadd.f32 %v670_v24, %v480_v27 }
 0x1fb   : > { %509 = vst [vmem:[#allocation2] sm:$0xff] %v505_v28 }
 0x1fc   : > { %v515_v29 = vlaneseq }
 0x1fe   : > { %v516_v30 = vand.u32 127, %v515_v29 }
 0x200   : > { %vm517_vm1 = vcmp.lt.s32.totalorder %v516_v30, 4 }
 0x201   : > { %v518_v31 = vsel %vm517_vm1, %v505_v28, -inf  ;;  %v519_v32 = vsel %vm517_vm1, %v506_v26, -inf }
 0x202   : > { %520 = vmax.xlane.f32.xlu0 %v518_v31 }
 0x206   : > { %522 = vmax.xlane.f32.xlu0 %v519_v32 }
 0x28b   : > { %v521_v33 = vpop.xlane.xlu0 %520 }
 0x28c   : > { %v524_v34 = vsub.f32 %v518_v31, %v521_v33 }
 0x28e   : > { %v526_v35 = vmul.f32 1.442695, %v524_v34 }
 0x28f   : > { %v523_v36 = vpop.xlane.xlu0 %522 }
 0x290   : > { %830 = vpow2.f32 %v526_v35  ;;  %v525_v37 = vsub.f32 %v519_v32, %v523_v36 }
 0x292   : > { %v528_v38 = vmul.f32 1.442695, %v525_v37 }
 0x294   : > { %832 = vpow2.f32 %v528_v38 }
 0x29d   : > { %v831_v39 = vpop.eup %830 }
 0x29e   : > { %v530_v40 = vsel %vm517_vm1, %v831_v39, 0.0 }
 0x29f   : > { %532 = vadd.xlane.f32.xlu1 %v530_v40 }
 0x2a1   : > { %v833_v41 = vpop.eup %832 }
 0x2a2   : > { %v531_v42 = vsel %vm517_vm1, %v833_v41, 0.0 }
 0x2a3   : > { %534 = vadd.xlane.f32.xlu1 %v531_v42 }
 0x328   : > { %v533_v43 = vpop.xlane.xlu1 %532 }
 0x329   : > { %834 = vrcp.f32 %v533_v43 }
 0x32c   : > { %v535_v44 = vpop.xlane.xlu1 %534 }
 0x32d   : > { %836 = vrcp.f32 %v535_v44 }
 0x336   : > { %v835_v45 = vpop.eup %834 }
 0x337   : > { %v538_v46 = vmul.f32 %v835_v45, %v530_v40 }
 0x339   : > { %540 = vst [vmem:[#allocation11] sm:$0xff] %v538_v46 }
 0x33a   : > { %v837_v47 = vpop.eup %836 }
 0x33b   : > { %v539_v48 = vmul.f32 %v837_v47, %v531_v42 }
 0x33d   : > { %541 = vst [vmem:[#allocation11 + $0x8] sm:$0xff] %v539_v48 }
 0x33e PF: > { %p773_p9 = scmp.eq.s32.totalorder %s1068_s21, 2  ;;  %s1011_s18 = smov [#allocation11]  }
 0x33f   : > { %s551_s7 = sshll.u32 %s1011_s18, 4  ;;  %s552_s7 = int_to_ptr.vmem [resolvable:$true] %s551_s7 }
 0x340   : > { %s918_s9 = scalar_lea.vmem %s552_s7, 256  ;;  %p925_p0 = scmp.lt.s32.totalorder %s552_s7, %s552_s7 }
 0x341   : > { %p919_p5 = scmp.ne.s32.totalorder %s552_s7, %s918_s9  ;;  %p926_p1 = scmp.lt.s32.totalorder %s918_s9, %s918_s9 }
 0x343   : > { %p920_p3 = pnand %p919_p5, %p773_p9  ;;  %p927_p2 = por %p926_p1, %p925_p0 }
 0x345   : > { %p921_p11 = pneg %p920_p3 }
 0x347   : > { %p928_p4 = pnand %p927_p2, %p921_p11 }
 0x349   : > { %931 = shalt.err (!%p928_p4)
}
 0x34a   : > { %s1012_s10 = smov 128   ;;  %s1013_s11 = smov 8  }
 0x34b   : > { %754 = dma.vmem_to_hbm [thread:$0]  (%p773_p9), %s552_s7, 256, %s1233_s4, [#allocation7], %s1012_s10, %s1012_s10, %s1013_s11  }
 0x34c   : > { %979 = dma.done.wait (%p773_p9), [#allocation7], 256  }
 0x34d   : > { %981 = vsyncadd (%p773_p9), [#allocation7], 4294967040 }
 0x34e PF: > { %s17_s20 = sadd.s32 1, %s1004_s20   ;;  %s1245_s15 = smov %s988_s16 }
 0x34f   : > { %p14_p13 = scmp.ge.s32.totalorder %s17_s20, 5   ;;  %s1246_s16 = smov %s992_s17 }
 0x350   : > { %s1247_s17 = smov %s1137_s8  ;;  %s1248_s18 = smov %s1000_s19 }
 0x351   : > { %s1249_s19 = smov %s1251_s12  ;;  %16 = sbr.rel (!%p14_p13) target bundleno = 5 (0x5), region = 107 }
 0x356   :  { %567 = vsyncpa [#allocation6], 1 }
 0x357   :  { %569 = vsyncpa [#allocation6 + $0x1], 1 }
 0x358   :  { %570 = vsyncpa [#allocation9], 1 }
 0x359   :  { %571 = vsyncpa [#allocation7], 1 }
 0x35a   :  { %573 = vsyncpa [#allocation7 + $0x1], 1 }

</bundles_post_ra>
